<compile_context>
chip_gen: v6e
topology: v6e:2x2x1
jax: 0.10.0
libtpu: 0.0.40
codegen_flags: <defaults>
</compile_context>

<pallas_src>
import functools

import jax
import jax.numpy as jnp
from jax.experimental import pallas as pl
from jax.experimental.pallas import tpu as pltpu


def _sepconv_kernel(x_ref, m_ref, w_ref, b_ref, o_ref, xbig_ref, *, c, width):
    # x_ref:    (C, L)     L = NB*H*W, NB images back-to-back on the lane axis
    # m_ref:    (4, C, L)  0/1 boundary masks [left, right, up, down]
    # w_ref:    (C, 5*C)   [center | left | right | up | down] tap weights
    # b_ref:    (C, 1)     bias1 + bias2
    # o_ref:    (C, L)
    # xbig_ref: (5*C, L)   VMEM scratch holding the fused-tap MXU operand
    x = x_ref[...]
    L = x.shape[1]

    # Shifted neighbor taps via XLU lane rotations; wrapped-around lanes are
    # exactly the zero-padding locations (incl. cross-image wraps), zeroed by
    # the precomputed masks.  Written straight into the scratch (no concat).
    xbig_ref[0:c, :] = x                                               # center
    xbig_ref[c:2 * c, :] = pltpu.roll(x, 1, 1) * m_ref[0]              # x[h, w-1]
    xbig_ref[2 * c:3 * c, :] = pltpu.roll(x, L - 1, 1) * m_ref[1]      # x[h, w+1]
    xbig_ref[3 * c:4 * c, :] = pltpu.roll(x, width, 1) * m_ref[2]      # x[h-1, w]
    xbig_ref[4 * c:5 * c, :] = pltpu.roll(x, L - width, 1) * m_ref[3]  # x[h+1, w]

    # Single fused K = 5*C contraction on the MXU; lane-dense (C, L) output.
    y = jnp.dot(w_ref[...], xbig_ref[...], preferred_element_type=jnp.float32)
    o_ref[...] = (y + b_ref[...]).astype(o_ref.dtype)


def _images_per_step(n, c, hw, itemsize):
    """Largest per-step image count that divides N and keeps the live VMEM
    footprint (x, 4 taps, 5C scratch, f32 acc, double-buffered in/out blocks)
    comfortably inside default scoped-VMEM limits (v7x's 64 MiB included)."""
    budget = 8 * 1024 * 1024
    per_image = 16 * c * hw * max(int(itemsize), 4)
    nb = max(1, min(n, budget // max(per_image, 1)))
    while n % nb != 0:
        nb -= 1
    return nb


def separable_conv_pallas(x_nchw, w1, b1, w2, b2):
    """x_nchw: (N, C, H, W). w1: (C, C, 1, 3), w2: (C, C, 3, 1) (PyTorch OIHW)."""
    N, C, H, W = x_nchw.shape
    HW = H * W
    dt = x_nchw.dtype

    NB = _images_per_step(N, C, HW, dt.itemsize)
    if (NB * HW) % 128 != 0:   # lane block must be 128-aligned unless full-dim
        NB = N
    steps = N // NB
    L = NB * HW

    # Fold batch onto the lane axis: (N, C, H, W) -> (C, N*HW).  One-off
    # wrapper-side relayout; everything downstream is lane-dense.
    x_lanes = jnp.transpose(x_nchw, (1, 0, 2, 3)).reshape(C, N * HW)

    # Grid-invariant 0/1 boundary masks, hoisted out of the kernel body.
    # Positions are taken modulo HW per image so the global rolls' cross-image
    # wraps are masked exactly like the zero padding.
    p = jnp.arange(L, dtype=jnp.int32) % HW         # position within its image
    wc = p % W                                      # w coordinate
    masks = jnp.stack([
        (wc >= 1),          # left  tap valid
        (wc <= W - 2),      # right tap valid
        (p >= W),           # up    tap valid
        (p < HW - W),       # down  tap valid
    ]).astype(dt)                                   # (4, L)
    masks = jnp.broadcast_to(masks[:, None, :], (4, C, L))

    # Per-tap (Cout, Cin) matrices; the shared center tap is pre-summed so the
    # kernel does 5 taps instead of 6, all concatenated into one (C, 5C)
    # weight (one small DMA, one MXU contraction).
    w1t = w1[:, :, 0, :]                            # (Co, Ci, 3)  taps over kw
    w2t = w2[:, :, :, 0]                            # (Co, Ci, 3)  taps over kh
    w_big = jnp.concatenate(
        [w1t[:, :, 1] + w2t[:, :, 1],               # center
         w1t[:, :, 0],                              # left   (x[h, w-1])
         w1t[:, :, 2],                              # right  (x[h, w+1])
         w2t[:, :, 0],                              # up     (x[h-1, w])
         w2t[:, :, 2]],                             # down   (x[h+1, w])
        axis=1)                                     # (Co, 5*Ci)
    b = (b1 + b2).reshape(C, 1)

    kernel = functools.partial(_sepconv_kernel, c=C, width=W)

    out_lanes = pl.pallas_call(
        kernel,
        out_shape=jax.ShapeDtypeStruct((C, N * HW), dt),
        grid_spec=pltpu.PrefetchScalarGridSpec(
            num_scalar_prefetch=0,
            grid=(steps,),
            in_specs=[
                pl.BlockSpec((C, L), lambda i: (0, i)),
                pl.BlockSpec((4, C, L), lambda i: (0, 0, 0)),   # resident
                pl.BlockSpec((C, 5 * C), lambda i: (0, 0)),     # resident
                pl.BlockSpec((C, 1), lambda i: (0, 0)),         # resident
            ],
            out_specs=pl.BlockSpec((C, L), lambda i: (0, i)),
            scratch_shapes=[pltpu.VMEM((5 * C, L), dt)],
        ),
        compiler_params=pltpu.CompilerParams(
            dimension_semantics=("parallel",)),
    )(x_lanes, masks, w_big, b)

    # Unfold: (C, N*HW) -> (N, C, H, W).
    return jnp.transpose(out_lanes.reshape(C, N, H, W), (1, 0, 2, 3))


def _reference(x_nchw, w1, b1, w2, b2):
    y1 = jax.lax.conv_general_dilated(
        x_nchw, w1, window_strides=(1, 1), padding=((0, 0), (1, 1)),
        dimension_numbers=("NCHW", "OIHW", "NCHW")) + b1[None, :, None, None]
    y2 = jax.lax.conv_general_dilated(
        x_nchw, w2, window_strides=(1, 1), padding=((1, 1), (0, 0)),
        dimension_numbers=("NCHW", "OIHW", "NCHW")) + b2[None, :, None, None]
    return y1 + y2


if __name__ == "__main__":
    N, C, H, W = 2, 8, 16, 16          # features_dim = 8 (small synthetic size)
    key = jax.random.PRNGKey(0)
    kx, k1, k1b, k2, k2b = jax.random.split(key, 5)

    x = jax.random.normal(kx, (N, C, H, W), jnp.float32)

    # PyTorch-style uniform init: U(-1/sqrt(fan_in), 1/sqrt(fan_in))
    bound1 = 1.0 / (C * 1 * 3) ** 0.5
    bound2 = 1.0 / (C * 3 * 1) ** 0.5
    w1 = jax.random.uniform(k1, (C, C, 1, 3), jnp.float32, -bound1, bound1)
    b1 = jax.random.uniform(k1b, (C,), jnp.float32, -bound1, bound1)
    w2 = jax.random.uniform(k2, (C, C, 3, 1), jnp.float32, -bound2, bound2)
    b2 = jax.random.uniform(k2b, (C,), jnp.float32, -bound2, bound2)

    out = separable_conv_pallas(x, w1, b1, w2, b2)
    out = jax.block_until_ready(out)

    ref = _reference(x, w1, b1, w2, b2)
    assert out.shape == ref.shape == (N, C, H, W)
    assert jnp.allclose(out, ref, atol=1e-4, rtol=1e-4)

    print("KERNEL_OK")
</pallas_src>

<mosaic_0001>
module attributes {stable_mosaic.version = 11 : i64} {
  func.func @_sepconv_kernel(%arg0: i32, %arg1: memref<8x512xf32, #tpu.memory_space<vmem>>, %arg2: memref<4x8x512xf32, #tpu.memory_space<vmem>>, %arg3: memref<8x40xf32, #tpu.memory_space<vmem>>, %arg4: memref<8x1xf32, #tpu.memory_space<vmem>>, %arg5: memref<8x512xf32, #tpu.memory_space<vmem>>, %arg6: memref<40x512xf32, #tpu.memory_space<vmem>>) attributes {dimension_semantics = [#tpu.dimension_semantics<parallel>], iteration_bounds = array<i64: 1>, scalar_prefetch = 0 : i64, scratch_operands = 1 : i64, tpu.core_type = #tpu.core_type<tc>, window_params = [{transform_indices = @transform_0, window_bounds = array<i64: 8, 512>}, {pipeline_mode = #tpu.pipeline_mode<synchronous>, transform_indices = @transform_1, window_bounds = array<i64: 4, 8, 512>}, {pipeline_mode = #tpu.pipeline_mode<synchronous>, transform_indices = @transform_2, window_bounds = array<i64: 8, 40>}, {pipeline_mode = #tpu.pipeline_mode<synchronous>, transform_indices = @transform_3, window_bounds = array<i64: 8, 1>}, {transform_indices = @transform_4, window_bounds = array<i64: 8, 512>}]} {
    %c0 = arith.constant 0 : index
    %c0_0 = arith.constant 0 : index
    %0 = vector.load %arg1[%c0, %c0_0] : memref<8x512xf32, #tpu.memory_space<vmem>>, vector<8x512xf32>
    %c0_1 = arith.constant 0 : index
    %c0_2 = arith.constant 0 : index
    %1 = vector.load %arg6[%c0_1, %c0_2] : memref<40x512xf32, #tpu.memory_space<vmem>>, vector<8x512xf32>
    tpu.vector_store %arg6[%c0_1, %c0_2], %0 {strides = array<i32>} : memref<40x512xf32, #tpu.memory_space<vmem>>, vector<8x512xf32>,
    %c1_i32 = arith.constant 1 : i32
    %2 = tpu.dynamic_rotate %0 by %c1_i32 dim 1 : vector<8x512xf32>, i32 -> vector<8x512xf32>
    %c0_3 = arith.constant 0 : index
    %c0_4 = arith.constant 0 : index
    %c0_5 = arith.constant 0 : index
    %3 = vector.load %arg2[%c0_3, %c0_4, %c0_5] : memref<4x8x512xf32, #tpu.memory_space<vmem>>, vector<1x8x512xf32>
    %4 = vector.shape_cast %3 : vector<1x8x512xf32> to vector<8x512xf32>
    %5 = arith.mulf %2, %4 : vector<8x512xf32>
    %c8 = arith.constant 8 : index
    %c0_6 = arith.constant 0 : index
    %6 = vector.load %arg6[%c8, %c0_6] : memref<40x512xf32, #tpu.memory_space<vmem>>, vector<8x512xf32>
    tpu.vector_store %arg6[%c8, %c0_6], %5 {strides = array<i32>} : memref<40x512xf32, #tpu.memory_space<vmem>>, vector<8x512xf32>,
    %c511_i32 = arith.constant 511 : i32
    %7 = tpu.dynamic_rotate %0 by %c511_i32 dim 1 : vector<8x512xf32>, i32 -> vector<8x512xf32>
    %c1 = arith.constant 1 : index
    %c0_7 = arith.constant 0 : index
    %c0_8 = arith.constant 0 : index
    %8 = vector.load %arg2[%c1, %c0_7, %c0_8] : memref<4x8x512xf32, #tpu.memory_space<vmem>>, vector<1x8x512xf32>
    %9 = vector.shape_cast %8 : vector<1x8x512xf32> to vector<8x512xf32>
    %10 = arith.mulf %7, %9 : vector<8x512xf32>
    %c16 = arith.constant 16 : index
    %c0_9 = arith.constant 0 : index
    %11 = vector.load %arg6[%c16, %c0_9] : memref<40x512xf32, #tpu.memory_space<vmem>>, vector<8x512xf32>
    tpu.vector_store %arg6[%c16, %c0_9], %10 {strides = array<i32>} : memref<40x512xf32, #tpu.memory_space<vmem>>, vector<8x512xf32>,
    %c16_i32 = arith.constant 16 : i32
    %12 = tpu.dynamic_rotate %0 by %c16_i32 dim 1 : vector<8x512xf32>, i32 -> vector<8x512xf32>
    %c2 = arith.constant 2 : index
    %c0_10 = arith.constant 0 : index
    %c0_11 = arith.constant 0 : index
    %13 = vector.load %arg2[%c2, %c0_10, %c0_11] : memref<4x8x512xf32, #tpu.memory_space<vmem>>, vector<1x8x512xf32>
    %14 = vector.shape_cast %13 : vector<1x8x512xf32> to vector<8x512xf32>
    %15 = arith.mulf %12, %14 : vector<8x512xf32>
    %c24 = arith.constant 24 : index
    %c0_12 = arith.constant 0 : index
    %16 = vector.load %arg6[%c24, %c0_12] : memref<40x512xf32, #tpu.memory_space<vmem>>, vector<8x512xf32>
    tpu.vector_store %arg6[%c24, %c0_12], %15 {strides = array<i32>} : memref<40x512xf32, #tpu.memory_space<vmem>>, vector<8x512xf32>,
    %c496_i32 = arith.constant 496 : i32
    %17 = tpu.dynamic_rotate %0 by %c496_i32 dim 1 : vector<8x512xf32>, i32 -> vector<8x512xf32>
    %c3 = arith.constant 3 : index
    %c0_13 = arith.constant 0 : index
    %c0_14 = arith.constant 0 : index
    %18 = vector.load %arg2[%c3, %c0_13, %c0_14] : memref<4x8x512xf32, #tpu.memory_space<vmem>>, vector<1x8x512xf32>
    %19 = vector.shape_cast %18 : vector<1x8x512xf32> to vector<8x512xf32>
    %20 = arith.mulf %17, %19 : vector<8x512xf32>
    %c32 = arith.constant 32 : index
    %c0_15 = arith.constant 0 : index
    %21 = vector.load %arg6[%c32, %c0_15] : memref<40x512xf32, #tpu.memory_space<vmem>>, vector<8x512xf32>
    tpu.vector_store %arg6[%c32, %c0_15], %20 {strides = array<i32>} : memref<40x512xf32, #tpu.memory_space<vmem>>, vector<8x512xf32>,
    %c0_16 = arith.constant 0 : index
    %c0_17 = arith.constant 0 : index
    %22 = vector.load %arg3[%c0_16, %c0_17] : memref<8x40xf32, #tpu.memory_space<vmem>>, vector<8x40xf32>
    %c0_18 = arith.constant 0 : index
    %c0_19 = arith.constant 0 : index
    %23 = vector.load %arg6[%c0_18, %c0_19] : memref<40x512xf32, #tpu.memory_space<vmem>>, vector<40x512xf32>
    %cst = arith.constant dense<0.000000e+00> : vector<8x512xf32>
    %24 = tpu.matmul %22, %23, %cst {dimension_numbers = #tpu.dot_dimension_numbers<[1], [0], [0], [1], [0, 0, 1, 1], [], []>} : vector<8x40xf32>, vector<40x512xf32>, vector<8x512xf32> -> vector<8x512xf32>
    %c0_20 = arith.constant 0 : index
    %c0_21 = arith.constant 0 : index
    %25 = vector.load %arg4[%c0_20, %c0_21] : memref<8x1xf32, #tpu.memory_space<vmem>>, vector<8x1xf32>
    %26 = vector.broadcast %25 : vector<8x1xf32> to vector<8x512xf32>
    %27 = arith.addf %24, %26 : vector<8x512xf32>
    %c0_22 = arith.constant 0 : index
    %c0_23 = arith.constant 0 : index
    %28 = vector.load %arg5[%c0_22, %c0_23] : memref<8x512xf32, #tpu.memory_space<vmem>>, vector<8x512xf32>
    tpu.vector_store %arg5[%c0_22, %c0_23], %27 {strides = array<i32>} : memref<8x512xf32, #tpu.memory_space<vmem>>, vector<8x512xf32>,
    return
  }
  func.func @transform_0(%arg0: i32) -> (i32, i32) {
    %c0_i32 = arith.constant 0 : i32
    %c0_i32_0 = arith.constant 0 : i32
    return %c0_i32, %arg0 : i32, i32
  }
  func.func @transform_1(%arg0: i32) -> (i32, i32, i32) {
    %c0_i32 = arith.constant 0 : i32
    %c0_i32_0 = arith.constant 0 : i32
    %c0_i32_1 = arith.constant 0 : i32
    %c0_i32_2 = arith.constant 0 : i32
    return %c0_i32, %c0_i32_0, %c0_i32_1 : i32, i32, i32
  }
  func.func @transform_2(%arg0: i32) -> (i32, i32) {
    %c0_i32 = arith.constant 0 : i32
    %c0_i32_0 = arith.constant 0 : i32
    %c0_i32_1 = arith.constant 0 : i32
    return %c0_i32, %c0_i32_0 : i32, i32
  }
  func.func @transform_3(%arg0: i32) -> (i32, i32) {
    %c0_i32 = arith.constant 0 : i32
    %c0_i32_0 = arith.constant 0 : i32
    %c0_i32_1 = arith.constant 0 : i32
    return %c0_i32, %c0_i32_0 : i32, i32
  }
  func.func @transform_4(%arg0: i32) -> (i32, i32) {
    %c0_i32 = arith.constant 0 : i32
    %c0_i32_0 = arith.constant 0 : i32
    return %c0_i32, %arg0 : i32, i32
  }
}

</mosaic_0001>

<bundles_post_ra>
// kernel: tpu_custom_call.1
= control target key start
LH: loop header
LB: loop body
LE: loop exit
PB: predicated region body
PF: predicated region fallthrough
CT: control target
= control target key end

     0   :  { %9 = vsyncpa [#allocation4], 0  ;;  %s531_s0 = inlined_call_operand.hbm [shape: f32[8,512], index: 0, kind: input, shape index: {}]   ;;  %s532_s1 = inlined_call_operand.hbm [shape: f32[4,8,512], index: 1, kind: input, shape index: {}]   ;;  %s533_s2 = inlined_call_operand.vmem [shape: f32[8,40], index: 2, kind: input, shape index: {}]   ;;  %s534_s3 = inlined_call_operand.vmem [shape: f32[8,1], index: 3, kind: input, shape index: {}]   ;;  %s535_s4 = inlined_call_operand.hbm [shape: f32[8,512], index: 4, kind: output, shape index: {}]  }
   0x1   :  { %10 = vsyncpa [#allocation7], 0 }
   0x2   :  { %11 = vsyncpa [#allocation5], 0  ;;  %s430_s15 = smov [#allocation3]   ;;  %s431_s17 = smov [#allocation6]  }
   0x3   :  { %s18_s16 = sshll.u32 %s430_s15, 4  ;;  %s27_s18 = sshll.u32 %s431_s17, 4  ;;  %s19_s16 = int_to_ptr.vmem [resolvable:$true] %s18_s16  ;;  %s28_s18 = int_to_ptr.vmem [resolvable:$true] %s27_s18 }
   0x4   :  { %s372_s19 = scalar_lea.vmem %s19_s16, 512  ;;  %p377_p1 = scmp.lt.s32.totalorder %s19_s16, %s19_s16 }
   0x5   :  { %p373_p0 = scmp.ne.s32.totalorder %s19_s16, %s372_s19  ;;  %p378_p2 = scmp.lt.s32.totalorder %s372_s19, %s372_s19 }
   0x7   :  { %p379_p3 = por %p378_p2, %p377_p1 }
   0x9   :  { %p380_p4 = pnand %p379_p3, %p373_p0 }
   0xb   :  { %383 = shalt.err (!%p380_p4)
}
   0xc   :  { %21 = dma.hbm_to_vmem [thread:$0]  %s531_s0, 512, %s19_s16, [#allocation4]  }
   0xd   :  { %s392_s22 = scalar_lea.vmem %s28_s18, 2048  ;;  %p397_p6 = scmp.lt.s32.totalorder %s28_s18, %s28_s18 }
   0xe   :  { %p393_p5 = scmp.ne.s32.totalorder %s28_s18, %s392_s22  ;;  %p398_p7 = scmp.lt.s32.totalorder %s392_s22, %s392_s22 }
  0x10   :  { %p399_p8 = por %p398_p7, %p397_p6 }
  0x12   :  { %p400_p9 = pnand %p399_p8, %p393_p5 }
  0x14   :  { %403 = shalt.err (!%p400_p9)
}
  0x15   :  { %s432_s23 = smov 512   ;;  %s433_s24 = smov 32  }
  0x16   :  { %33 = dma.hbm_to_vmem [thread:$0]  %s532_s1, 2048, %s28_s18, [#allocation7], %s432_s23, %s432_s23, %s433_s24  }
  0x17   :  { %424 = dma.done.wait [#allocation4], 512  }
  0x18   :  { %425 = vsyncadd [#allocation4], 4294966784 }
  0x19   :  { %426 = dma.done.wait [#allocation7], 2048  }
  0x1a   :  { %427 = vsyncadd [#allocation7], 4294965248  ;;  %v472_v0 = vld [vmem:[#allocation3 + $0x10] sm:$0xff]  ;;  %v474_v1 = vld [vmem:[#allocation3] sm:$0xff]  ;;  %s434_s0 = smov 112   ;;  %s435_s1 = smov 16   ;;  %v60_v7 = vlaneseq }
  0x1b   :  { %135 = vrot.lane.b32.xlu1 %v472_v0, %s434_s0  ;;  %131 = vrot.lane.b32.xlu0 %v474_v1, %s434_s0  ;;  %v478_v2 = vld [vmem:[#allocation3 + $0x18] sm:$0xff]  ;;  %v480_v3 = vld [vmem:[#allocation3 + $0x8] sm:$0xff]  ;;  %s436_s27 = smov 127   ;;  %v437_v4 = vmov 0.0   ;;  %v438_v5 = vmov 0   ;;  %s439_s28 = smov 1  }
  0x1c   :  { %252 = vmatprep.mubr.f32.mxu0 %v437_v4  ;;  %323 = vmatprep.mubr.f32.mxu1 %v437_v4  ;;  %v178_v6 = vld [vmem:[%s534_s3] sm:$0xff]  ;;  %v499_v8 = vand.u32 127, %v60_v7  ;;  %v146_v11 = vld [vmem:[#allocation6 + $0x68] sm:$0xff]  ;;  %v148_v12 = vld [vmem:[#allocation6 + $0x78] sm:$0xff]  ;;  %vm184_vm4 = vcmask 326656   ;;  %s440_s6 = smov [#allocation8]  }
  0x1d   :  { %363 = vset.pattern.permute.xlu0 %v438_v5  ;;  %v145_v13 = vld [vmem:[#allocation6 + $0x60] sm:$0xff]  ;;  %v147_v14 = vld [vmem:[#allocation6 + $0x70] sm:$0xff]  ;;  %v120_v25 = vld [vmem:[#allocation6 + $0x48] sm:$0xff]  ;;  %s340_s7 = sshll.u32 %s440_s6, 4  ;;  %s341_s7 = int_to_ptr.vmem [resolvable:$true] %s340_s7 }
  0x1e   :  { %vm139_vm0 = vcmp.lt.s32.totalorder %v499_v8, 112  ;;  %vm113_vm1 = vcmp.lt.s32.totalorder %v499_v8, 16  ;;  %v119_v30 = vld [vmem:[#allocation6 + $0x40] sm:$0xff]  ;;  %v121_v31 = vld [vmem:[#allocation6 + $0x50] sm:$0xff]  ;;  %v122_v32 = vld [vmem:[#allocation6 + $0x58] sm:$0xff]  ;;  %vm87_vm2 = vcmp.lt.s32.totalorder %v499_v8, 127  ;;  %p409_p11 = scmp.lt.s32.totalorder %s341_s7, %s341_s7 }
  0x1f   :  { %137 = vrot.lane.b32.xlu1 %v478_v2, %s434_s0  ;;  %133 = vrot.lane.b32.xlu0 %v480_v3, %s434_s0  ;;  %v96_v43 = vld [vmem:[#allocation6 + $0x38] sm:$0xff]  ;;  %v94_v44 = vld [vmem:[#allocation6 + $0x28] sm:$0xff]  ;;  %v95_v45 = vld [vmem:[#allocation6 + $0x30] sm:$0xff]  ;;  %vm62_vm3 = vcmp.lt.s32.totalorder %v499_v8, 1 }
  0x20   :  { %v93_v46 = vld [vmem:[#allocation6 + $0x20] sm:$0xff]  ;;  %v68_v57 = vld [vmem:[#allocation6 + $0x8] sm:$0xff]  ;;  %v69_v63 = vld [vmem:[#allocation6 + $0x10] sm:$0xff] }
  0x21   :  { %v67_v62 = vld [vmem:[#allocation6] sm:$0xff]  ;;  %v70_v4 = vld [vmem:[#allocation6 + $0x18] sm:$0xff] }
  0x23   :  { %107 = vrot.lane.b32.xlu1 %v480_v3, %s435_s1  ;;  %105 = vrot.lane.b32.xlu0 %v474_v1, %s435_s1 }
  0x27   :  { %111 = vrot.lane.b32.xlu1 %v478_v2, %s435_s1  ;;  %109 = vrot.lane.b32.xlu0 %v472_v0, %s435_s1 }
  0x2b   :  { %81 = vrot.lane.b32.xlu1 %v480_v3, %s436_s27  ;;  %79 = vrot.lane.b32.xlu0 %v474_v1, %s436_s27 }
  0x2f   :  { %85 = vrot.lane.b32.xlu1 %v478_v2, %s436_s27  ;;  %83 = vrot.lane.b32.xlu0 %v472_v0, %s436_s27 }
  0x33   :  { %54 = vrot.lane.b32.xlu1 %v480_v3, %s439_s28  ;;  %52 = vrot.lane.b32.xlu0 %v474_v1, %s439_s28 }
  0x37   :  { %58 = vrot.lane.b32.xlu1 %v478_v2, %s439_s28  ;;  %56 = vrot.lane.b32.xlu0 %v472_v0, %s439_s28 }
  0x3b   :  { %181 = vperm.xlu0 %363, %v178_v6  }
  0x8d   :  { %v136_v9 = vpop.permute.xlu1 %135  ;;  %v132_v10 = vpop.permute.xlu0 %131 }
  0x91   :  { %v138_v15 = vpop.permute.xlu1 %137  ;;  %v134_v16 = vpop.permute.xlu0 %133 }
  0x92   :  { %v140_v17 = vsel %vm139_vm0, %v136_v9, %v138_v15  ;;  %v142_v18 = vsel %vm139_vm0, %v132_v10, %v134_v16  ;;  %v141_v19 = vsel %vm139_vm0, %v134_v16, %v136_v9  ;;  %v143_v20 = vsel %vm139_vm0, %v138_v15, %v132_v10 }
  0x93   :  { %v150_v21 = vmul.f32 %v146_v11, %v141_v19  ;;  %v152_v22 = vmul.f32 %v148_v12, %v143_v20  ;;  %v149_v23 = vmul.f32 %v145_v13, %v142_v18  ;;  %v151_v24 = vmul.f32 %v147_v14, %v140_v17  ;;  %v157_v14 = vld [vmem:[%s533_s2] sm:$0xff]  ;;  %s404_s2 = scalar_lea.vmem %s341_s7, 512 }
  0x94   :  { %p405_p10 = scmp.ne.s32.totalorder %s341_s7, %s404_s2  ;;  %p410_p12 = scmp.lt.s32.totalorder %s404_s2, %s404_s2 }
  0x95   :  { %v108_v26 = vpop.permute.xlu1 %107  ;;  %210 = vmatprep.subr.mxu0 %v150_v21  ;;  %281 = vmatprep.subr.mxu1 %v152_v22  ;;  %v106_v27 = vpop.permute.xlu0 %105 }
  0x96   :  { %v116_v28 = vsel %vm113_vm1, %v106_v27, %v108_v26  ;;  %211 = vmatpush1.msra.mxu0 %v149_v23  ;;  %282 = vmatpush1.msra.mxu1 %v151_v24  ;;  %p411_p13 = por %p410_p12, %p409_p11 }
  0x97   :  { %v124_v29 = vmul.f32 %v120_v25, %v116_v28 }
  0x98   :  { %p412_p0 = pnand %p411_p13, %p405_p10 }
  0x99   :  { %v112_v33 = vpop.permute.xlu1 %111  ;;  %212 = vmatprep.subr.mxu0 %v124_v29  ;;  %v110_v34 = vpop.permute.xlu0 %109 }
  0x9a   :  { %v117_v35 = vsel %vm113_vm1, %v112_v33, %v106_v27  ;;  %v114_v36 = vsel %vm113_vm1, %v110_v34, %v112_v33  ;;  %v115_v37 = vsel %vm113_vm1, %v108_v26, %v110_v34 }
  0x9b   :  { %v123_v38 = vmul.f32 %v119_v30, %v117_v35  ;;  %v125_v39 = vmul.f32 %v121_v31, %v115_v37  ;;  %v126_v40 = vmul.f32 %v122_v32, %v114_v36 }
  0x9d   :  { %v82_v41 = vpop.permute.xlu1 %81  ;;  %213 = vmatpush1.msra.mxu0 %v123_v38  ;;  %283 = vmatprep.subr.mxu1 %v126_v40  ;;  %v80_v42 = vpop.permute.xlu0 %79 }
  0x9e   :  { %284 = vmatpush1.msra.mxu1 %v125_v39  ;;  %v90_v47 = vsel %vm87_vm2, %v80_v42, %v82_v41 }
  0x9f   :  { %v97_v56 = vmul.f32 %v93_v46, %v90_v47 }
  0xa1   :  { %v86_v48 = vpop.permute.xlu1 %85  ;;  %v84_v49 = vpop.permute.xlu0 %83 }
  0xa2   :  { %v91_v50 = vsel %vm87_vm2, %v86_v48, %v80_v42  ;;  %v88_v51 = vsel %vm87_vm2, %v84_v49, %v86_v48  ;;  %v89_v52 = vsel %vm87_vm2, %v82_v41, %v84_v49 }
  0xa3   :  { %v100_v53 = vmul.f32 %v96_v43, %v91_v50  ;;  %v98_v54 = vmul.f32 %v94_v44, %v89_v52  ;;  %v99_v55 = vmul.f32 %v95_v45, %v88_v51 }
  0xa5   :  { %v55_v58 = vpop.permute.xlu1 %54  ;;  %214 = vmatprep.subr.mxu0 %v98_v54  ;;  %285 = vmatprep.subr.mxu1 %v100_v53  ;;  %v53_v59 = vpop.permute.xlu0 %52 }
  0xa6   :  { %v65_v60 = vsel %vm62_vm3, %v53_v59, %v55_v58  ;;  %215 = vmatpush1.msra.mxu0 %v97_v56  ;;  %286 = vmatpush1.msra.mxu1 %v99_v55 }
  0xa7   :  { %v72_v61 = vmul.f32 %v68_v57, %v65_v60 }
  0xa9   :  { %v59_v5 = vpop.permute.xlu1 %58  ;;  %216 = vmatprep.subr.mxu0 %v72_v61  ;;  %v57_v6 = vpop.permute.xlu0 %56 }
  0xaa   :  { %v66_v7 = vsel %vm62_vm3, %v59_v5, %v53_v59  ;;  %v63_v9 = vsel %vm62_vm3, %v57_v6, %v59_v5  ;;  %v64_v10 = vsel %vm62_vm3, %v55_v58, %v57_v6 }
  0xab   :  { %v71_v11 = vmul.f32 %v67_v62, %v66_v7  ;;  %v73_v12 = vmul.f32 %v69_v63, %v64_v10  ;;  %v74_v13 = vmul.f32 %v70_v4, %v63_v9 }
  0xad   :  { %217 = vmatpush1.msra.mxu0 %v71_v11  ;;  %287 = vmatprep.subr.mxu1 %v74_v13 }
  0xae   :  { %218 = vmatprep.subr.mxu0 %v480_v3  ;;  %288 = vmatpush1.msra.mxu1 %v73_v12 }
  0xaf   :  { %219 = vmatpush1.msra.mxu0 %v474_v1  ;;  %289 = vmatprep.subr.mxu1 %v478_v2 }
  0xb0   :  { %350 = vmatmul.mubr.msk.f32.vlgmr.msra.gmra.mxu0 %vm184_vm4, %v157_v14  ;;  %290 = vmatpush1.msra.mxu1 %v472_v0 }
  0xb1   :  { %351 = vmatmul.mubr.msk.f32.vlgmr.msra.gmra.mxu1 %vm184_vm4, %v157_v14 }
  0xb6   :  { %v182_v8 = vpop.permute.xlu0 %181 }
 0x170   :  { %v254_v15 = vpop.f32.mrf.mxu0 }
 0x171   :  { %v325_v16 = vpop.f32.mrf.mxu1  ;;  %v255_v17 = vadd.f32 %v254_v15, %v182_v8 }
 0x172   :  { %v326_v18 = vadd.f32 %v325_v16, %v182_v8  ;;  %v256_v19 = vpop.f32.mrf.mxu0 }
 0x173   :  { %330 = vst [vmem:[#allocation8] sm:$0xff] %v255_v17  ;;  %v257_v20 = vadd.f32 %v256_v19, %v182_v8  ;;  %v327_v3 = vpop.f32.mrf.mxu1 }
 0x174   :  { %332 = vst [vmem:[#allocation8 + $0x10] sm:$0xff] %v326_v18  ;;  %v328_v21 = vadd.f32 %v327_v3, %v182_v8 }
 0x175   :  { %331 = vst [vmem:[#allocation8 + $0x8] sm:$0xff] %v257_v20 }
 0x176   :  { %333 = vst [vmem:[#allocation8 + $0x18] sm:$0xff] %v328_v21 }
 0x177   :  { %415 = shalt.err (!%p412_p0)
}
 0x178   :  { %343 = dma.vmem_to_hbm [thread:$0]  %s341_s7, 512, %s535_s4, [#allocation5]  }
 0x179   :  { %428 = dma.done.wait [#allocation5], 512  }
 0x17a   :  { %429 = vsyncadd [#allocation5], 4294966784 }
 0x17b   :  { %347 = vsyncpa [#allocation4], 1 }
 0x17c   :  { %348 = vsyncpa [#allocation7], 1 }
 0x17d   :  { %349 = vsyncpa [#allocation5], 1 }

</bundles_post_ra>
